<compile_context>
chip_gen: v7x
topology: tpu7x:2x2x1
jax: 0.10.0
libtpu: 0.0.40
codegen_flags: <defaults>
</compile_context>

<pallas_src>
import functools

import numpy as np
import jax
import jax.numpy as jnp
from jax.experimental import pallas as pl
from jax.experimental.pallas import tpu as pltpu


def _cdiv(a, b):
    return (a + b - 1) // b


def _nmse_kernel(pred_ref, target_ref, num_ref, den_ref, num_acc, den_acc, *,
                 n_valid, tn, last_ni, acc_rows, needs_row_mask):
    """grid = (F tiles [parallel], N tiles [arbitrary / reduction])."""
    ni = pl.program_id(1)   # top-level only (interpret/compile safe)

    @pl.when(ni == 0)
    def _init():
        num_acc[...] = jnp.zeros_like(num_acc)
        den_acc[...] = jnp.zeros_like(den_acc)

    # Load in native dtype (bf16 halves HBM traffic), accumulate in f32.
    t = target_ref[...].astype(jnp.float32)
    p = pred_ref[...].astype(jnp.float32)

    if needs_row_mask:
        # Zero rows past the true batch size in the (ragged) last N tile so
        # garbage rows contribute 0 to both sums.
        row = jax.lax.broadcasted_iota(jnp.int32, t.shape, 0)
        valid = (ni * tn + row) < n_valid
        zero = jnp.zeros_like(t)
        t = jnp.where(valid, t, zero)
        p = jnp.where(valid, p, zero)

    d = t - p
    sq_num = d * d
    sq_den = t * t

    if acc_rows > 1:
        # Keep per-step sums per-sublane (pure VPU adds over the leading
        # axis); the 8->1 cross-sublane (XLU) reduce happens only in finalize.
        g = tn // acc_rows
        num_acc[...] += sq_num.reshape(g, acc_rows, -1).sum(axis=0)
        den_acc[...] += sq_den.reshape(g, acc_rows, -1).sum(axis=0)
    else:
        num_acc[...] += sq_num.sum(axis=0, keepdims=True)
        den_acc[...] += sq_den.sum(axis=0, keepdims=True)

    @pl.when(ni == last_ni)
    def _finalize():
        num_ref[...] = jnp.sum(num_acc[...], axis=0, keepdims=True)
        den_ref[...] = jnp.sum(den_acc[...], axis=0, keepdims=True)


def nmse_loss(pred, target, *, vmem_budget_bytes=12 * 1024 * 1024,
              max_tf=2048):
    if pred.shape != target.shape:
        raise ValueError(
            'Target size ({}) must be the same as input size ({})'.format(
                target.shape, pred.shape))

    n = pred.shape[0]
    f = int(np.prod(pred.shape[1:])) if pred.ndim > 1 else 1
    pred2 = pred.reshape(n, f)
    target2 = target.reshape(n, f)

    # ---- Feature tile (lanes). ----
    if f <= 128:
        tf = f                          # full feature dim; no ragged lanes
    else:
        lane_groups = _cdiv(f, 128)
        max_groups = max(1, max_tf // 128)
        if lane_groups <= max_groups:
            # Whole F would fit in one tile: split in two so the parallel F
            # axis has >= 2 iterations (keeps both v7x TensorCores busy).
            tf = _cdiv(lane_groups, 2) * 128
        else:
            tf = max_groups * 128
    grid_f = _cdiv(f, tf)
    out_f = grid_f * tf

    # ---- Batch tile (sublanes) from the double-buffered VMEM budget. ----
    itemsize = jnp.dtype(pred2.dtype).itemsize
    tn_cap = vmem_budget_bytes // (4 * tf * itemsize)   # 2 inputs x 2 buffers
    tn_cap = max(8, (tn_cap // 8) * 8)
    tn = n if n <= tn_cap else tn_cap
    grid_n = _cdiv(n, tn)

    needs_row_mask = (n % tn) != 0
    acc_rows = 8 if (tn % 8 == 0) else 1

    kernel = functools.partial(
        _nmse_kernel, n_valid=n, tn=tn, last_ni=grid_n - 1,
        acc_rows=acc_rows, needs_row_mask=needs_row_mask)

    cost = pl.CostEstimate(
        flops=5 * n * f,
        transcendentals=0,
        bytes_accessed=2 * n * f * itemsize + 2 * out_f * 4,
    )

    num, den = pl.pallas_call(
        kernel,
        out_shape=(jax.ShapeDtypeStruct((1, out_f), jnp.float32),
                   jax.ShapeDtypeStruct((1, out_f), jnp.float32)),
        grid_spec=pltpu.PrefetchScalarGridSpec(
            num_scalar_prefetch=0,
            grid=(grid_f, grid_n),
            in_specs=[
                pl.BlockSpec((tn, tf), lambda fi, ni: (ni, fi)),
                pl.BlockSpec((tn, tf), lambda fi, ni: (ni, fi)),
            ],
            out_specs=(
                pl.BlockSpec((1, tf), lambda fi, ni: (0, fi)),
                pl.BlockSpec((1, tf), lambda fi, ni: (0, fi)),
            ),
            scratch_shapes=[
                pltpu.VMEM((acc_rows, tf), jnp.float32),   # num accumulator
                pltpu.VMEM((acc_rows, tf), jnp.float32),   # den accumulator
            ],
        ),
        compiler_params=pltpu.CompilerParams(
            dimension_semantics=("parallel", "arbitrary"),
        ),
        cost_estimate=cost,
    )(pred2, target2)

    # Ragged feature lanes (if any) are dropped here, BEFORE the divide, so
    # garbage / 0-by-0 lanes never propagate. Division by zero in a *valid*
    # column intentionally yields inf/nan, matching the PyTorch reference.
    num_v = num[0, :f]
    den_v = den[0, :f]
    return jnp.sum(num_v / den_v)


def nmse_loss_ref(pred, target):
    t = target.astype(jnp.float32).reshape(target.shape[0], -1)
    p = pred.astype(jnp.float32).reshape(pred.shape[0], -1)
    num = jnp.sum((t - p) ** 2, axis=0)
    den = jnp.sum(t ** 2, axis=0)
    return jnp.sum(num / den)


if __name__ == "__main__":
    key = jax.random.PRNGKey(0)
    k1, k2, k3, k4, k5, k6, k7, k8 = jax.random.split(key, 8)

    # Case 1: (batch=8, traits=32) f32 — single tile, tf == F (no raggedness).
    pred = jax.random.normal(k1, (8, 32), dtype=jnp.float32)
    target = jax.random.normal(k2, (8, 32), dtype=jnp.float32)
    out = nmse_loss(pred, target)
    jax.block_until_ready(out)
    np.testing.assert_allclose(np.asarray(out),
                               np.asarray(nmse_loss_ref(pred, target)),
                               rtol=1e-4, atol=1e-4)

    # Case 2: 3-D input flattened to (24, 200) — two parallel F tiles.
    pred_b = jax.random.normal(k3, (24, 5, 40), dtype=jnp.float32)
    target_b = jax.random.normal(k4, (24, 5, 40), dtype=jnp.float32)
    out_b = nmse_loss(pred_b, target_b)
    jax.block_until_ready(out_b)
    np.testing.assert_allclose(np.asarray(out_b),
                               np.asarray(nmse_loss_ref(pred_b, target_b)),
                               rtol=1e-4, atol=1e-4)

    # Case 3: bf16 inputs loaded natively, accumulated in f32.
    pred_c = jax.random.normal(k5, (16, 48), dtype=jnp.bfloat16)
    target_c = jax.random.normal(k6, (16, 48), dtype=jnp.bfloat16)
    out_c = nmse_loss(pred_c, target_c)
    jax.block_until_ready(out_c)
    np.testing.assert_allclose(np.asarray(out_c),
                               np.asarray(nmse_loss_ref(pred_c, target_c)),
                               rtol=2e-3, atol=2e-3)

    # Case 4: (37, 300) with a tiny VMEM budget to force multi-tile batch
    # reduction, a ragged last batch tile (row mask) and ragged F lanes.
    pred_d = jax.random.normal(k7, (37, 300), dtype=jnp.float32)
    target_d = jax.random.normal(k8, (37, 300), dtype=jnp.float32)
    out_d = nmse_loss(pred_d, target_d, vmem_budget_bytes=64 * 1024)
    jax.block_until_ready(out_d)
    np.testing.assert_allclose(np.asarray(out_d),
                               np.asarray(nmse_loss_ref(pred_d, target_d)),
                               rtol=1e-4, atol=1e-4)

    print("KERNEL_OK")
</pallas_src>

<mosaic_0001>
module attributes {stable_mosaic.version = 11 : i64} {
  func.func @_nmse_kernel(%arg0: i32, %arg1: i32, %arg2: memref<8x32xf32, #tpu.memory_space<vmem>>, %arg3: memref<8x32xf32, #tpu.memory_space<vmem>>, %arg4: memref<1x32xf32, #tpu.memory_space<vmem>>, %arg5: memref<1x32xf32, #tpu.memory_space<vmem>>, %arg6: memref<8x32xf32, #tpu.memory_space<vmem>>, %arg7: memref<8x32xf32, #tpu.memory_space<vmem>>) attributes {dimension_semantics = [#tpu.dimension_semantics<parallel>, #tpu.dimension_semantics<arbitrary>], iteration_bounds = array<i64: 1, 1>, scalar_prefetch = 0 : i64, scratch_operands = 2 : i64, tpu.core_type = #tpu.core_type<tc>, window_params = [{transform_indices = @transform_0, window_bounds = array<i64: 8, 32>}, {transform_indices = @transform_1, window_bounds = array<i64: 8, 32>}, {transform_indices = @transform_2, window_bounds = array<i64: 1, 32>}, {transform_indices = @transform_3, window_bounds = array<i64: 1, 32>}]} {
    %c0_i32 = arith.constant 0 : i32
    %0 = arith.cmpi eq, %arg1, %c0_i32 : i32
    %1 = arith.extui %0 : i1 to i32
    %c0_i32_0 = arith.constant 0 : i32
    %2 = arith.cmpi ne, %1, %c0_i32_0 : i32
    scf.if %2 {
      %cst_15 = arith.constant 0.000000e+00 : f32
      %21 = vector.broadcast %cst_15 : f32 to vector<8x32xf32>
      %c0_16 = arith.constant 0 : index
      %c0_17 = arith.constant 0 : index
      %22 = vector.load %arg6[%c0_16, %c0_17] : memref<8x32xf32, #tpu.memory_space<vmem>>, vector<8x32xf32>
      tpu.vector_store %arg6[%c0_16, %c0_17], %21 {strides = array<i32>} : memref<8x32xf32, #tpu.memory_space<vmem>>, vector<8x32xf32>,
      %cst_18 = arith.constant 0.000000e+00 : f32
      %23 = vector.broadcast %cst_18 : f32 to vector<8x32xf32>
      %c0_19 = arith.constant 0 : index
      %c0_20 = arith.constant 0 : index
      %24 = vector.load %arg7[%c0_19, %c0_20] : memref<8x32xf32, #tpu.memory_space<vmem>>, vector<8x32xf32>
      tpu.vector_store %arg7[%c0_19, %c0_20], %23 {strides = array<i32>} : memref<8x32xf32, #tpu.memory_space<vmem>>, vector<8x32xf32>,
    } else {
    }
    %c0 = arith.constant 0 : index
    %c0_1 = arith.constant 0 : index
    %3 = vector.load %arg3[%c0, %c0_1] : memref<8x32xf32, #tpu.memory_space<vmem>>, vector<8x32xf32>
    %c0_2 = arith.constant 0 : index
    %c0_3 = arith.constant 0 : index
    %4 = vector.load %arg2[%c0_2, %c0_3] : memref<8x32xf32, #tpu.memory_space<vmem>>, vector<8x32xf32>
    %5 = arith.subf %3, %4 : vector<8x32xf32>
    %6 = arith.mulf %5, %5 : vector<8x32xf32>
    %7 = arith.mulf %3, %3 : vector<8x32xf32>
    %c0_4 = arith.constant 0 : index
    %c0_5 = arith.constant 0 : index
    %8 = vector.load %arg6[%c0_4, %c0_5] : memref<8x32xf32, #tpu.memory_space<vmem>>, vector<8x32xf32>
    %9 = vector.shape_cast %6 : vector<8x32xf32> to vector<1x8x32xf32>
    %cst = arith.constant dense<0.000000e+00> : vector<8x32xf32>
    %10 = vector.multi_reduction <add>, %9, %cst [0] : vector<1x8x32xf32> to vector<8x32xf32>
    %11 = arith.addf %8, %10 : vector<8x32xf32>
    %c0_6 = arith.constant 0 : index
    %c0_7 = arith.constant 0 : index
    %12 = vector.load %arg6[%c0_6, %c0_7] : memref<8x32xf32, #tpu.memory_space<vmem>>, vector<8x32xf32>
    tpu.vector_store %arg6[%c0_6, %c0_7], %11 {strides = array<i32>} : memref<8x32xf32, #tpu.memory_space<vmem>>, vector<8x32xf32>,
    %c0_8 = arith.constant 0 : index
    %c0_9 = arith.constant 0 : index
    %13 = vector.load %arg7[%c0_8, %c0_9] : memref<8x32xf32, #tpu.memory_space<vmem>>, vector<8x32xf32>
    %14 = vector.shape_cast %7 : vector<8x32xf32> to vector<1x8x32xf32>
    %cst_10 = arith.constant dense<0.000000e+00> : vector<8x32xf32>
    %15 = vector.multi_reduction <add>, %14, %cst_10 [0] : vector<1x8x32xf32> to vector<8x32xf32>
    %16 = arith.addf %13, %15 : vector<8x32xf32>
    %c0_11 = arith.constant 0 : index
    %c0_12 = arith.constant 0 : index
    %17 = vector.load %arg7[%c0_11, %c0_12] : memref<8x32xf32, #tpu.memory_space<vmem>>, vector<8x32xf32>
    tpu.vector_store %arg7[%c0_11, %c0_12], %16 {strides = array<i32>} : memref<8x32xf32, #tpu.memory_space<vmem>>, vector<8x32xf32>,
    %c0_i32_13 = arith.constant 0 : i32
    %18 = arith.cmpi eq, %arg1, %c0_i32_13 : i32
    %19 = arith.extui %18 : i1 to i32
    %c0_i32_14 = arith.constant 0 : i32
    %20 = arith.cmpi ne, %19, %c0_i32_14 : i32
    scf.if %20 {
      %c0_15 = arith.constant 0 : index
      %c0_16 = arith.constant 0 : index
      %21 = vector.load %arg6[%c0_15, %c0_16] : memref<8x32xf32, #tpu.memory_space<vmem>>, vector<8x32xf32>
      %cst_17 = arith.constant dense<0.000000e+00> : vector<32xf32>
      %22 = vector.multi_reduction <add>, %21, %cst_17 [0] : vector<8x32xf32> to vector<32xf32>
      %23 = vector.shape_cast %22 : vector<32xf32> to vector<1x32xf32>
      %c0_18 = arith.constant 0 : index
      %c0_19 = arith.constant 0 : index
      %24 = vector.load %arg4[%c0_18, %c0_19] : memref<1x32xf32, #tpu.memory_space<vmem>>, vector<1x32xf32>
      tpu.vector_store %arg4[%c0_18, %c0_19], %23 {strides = array<i32>} : memref<1x32xf32, #tpu.memory_space<vmem>>, vector<1x32xf32>,
      %c0_20 = arith.constant 0 : index
      %c0_21 = arith.constant 0 : index
      %25 = vector.load %arg7[%c0_20, %c0_21] : memref<8x32xf32, #tpu.memory_space<vmem>>, vector<8x32xf32>
      %cst_22 = arith.constant dense<0.000000e+00> : vector<32xf32>
      %26 = vector.multi_reduction <add>, %25, %cst_22 [0] : vector<8x32xf32> to vector<32xf32>
      %27 = vector.shape_cast %26 : vector<32xf32> to vector<1x32xf32>
      %c0_23 = arith.constant 0 : index
      %c0_24 = arith.constant 0 : index
      %28 = vector.load %arg5[%c0_23, %c0_24] : memref<1x32xf32, #tpu.memory_space<vmem>>, vector<1x32xf32>
      tpu.vector_store %arg5[%c0_23, %c0_24], %27 {strides = array<i32>} : memref<1x32xf32, #tpu.memory_space<vmem>>, vector<1x32xf32>,
    } else {
    }
    return
  }
  func.func @transform_0(%arg0: i32, %arg1: i32) -> (i32, i32) {
    %c0_i32 = arith.constant 0 : i32
    return %arg1, %arg0 : i32, i32
  }
  func.func @transform_1(%arg0: i32, %arg1: i32) -> (i32, i32) {
    %c0_i32 = arith.constant 0 : i32
    return %arg1, %arg0 : i32, i32
  }
  func.func @transform_2(%arg0: i32, %arg1: i32) -> (i32, i32) {
    %c0_i32 = arith.constant 0 : i32
    %c0_i32_0 = arith.constant 0 : i32
    return %c0_i32, %arg0 : i32, i32
  }
  func.func @transform_3(%arg0: i32, %arg1: i32) -> (i32, i32) {
    %c0_i32 = arith.constant 0 : i32
    %c0_i32_0 = arith.constant 0 : i32
    return %c0_i32, %arg0 : i32, i32
  }
}

</mosaic_0001>

<bundles_post_ra>
// kernel: tpu_custom_call.1
= control target key start
LH: loop header
LB: loop body
LE: loop exit
PB: predicated region body
PF: predicated region fallthrough
CT: control target
= control target key end

     0   :  { %9 = vsyncpa [#allocation5], 0  ;;  %s302_s0 = inlined_call_operand.hbm [shape: f32[8,32], index: 0, kind: input, shape index: {}]   ;;  %s303_s1 = inlined_call_operand.hbm [shape: f32[8,32], index: 1, kind: input, shape index: {}]   ;;  %s304_s2 = inlined_call_operand.hbm [shape: f32[1,32], index: 2, kind: output, shape index: {0}]   ;;  %s305_s3 = inlined_call_operand.hbm [shape: f32[1,32], index: 3, kind: output, shape index: {1}]  }
   0x1   :  { %10 = vsyncpa [#allocation8], 0 }
   0x2   :  { %11 = vsyncpa [#allocation6], 0 }
   0x3   :  { %12 = vsyncpa [#allocation11], 0  ;;  %s213_s12 = smov [#allocation4]   ;;  %s214_s14 = smov [#allocation7]  }
   0x4   :  { %s19_s13 = sshll.u32 %s213_s12, 4  ;;  %s29_s15 = sshll.u32 %s214_s14, 4  ;;  %s20_s13 = int_to_ptr.vmem [resolvable:$true] %s19_s13  ;;  %s30_s15 = int_to_ptr.vmem [resolvable:$true] %s29_s15 }
   0x5   :  { %s117_s18 = scalar_lea.hbm %s302_s0, 128 }
   0x6   :  { %p118_p0 = scmp.ne.s32.totalorder %s302_s0, %s117_s18  ;;  %p121_p1 = scmp.lt.u32.totalorder %s117_s18, %s302_s0 }
   0x8   :  { %p123_p2 = pnand %p121_p1, %p118_p0 }
   0xa   :  { %126 = shalt.err (!%p123_p2)
}
   0xb   :  { %s127_s23 = scalar_lea.vmem %s20_s13, 128  ;;  %p132_p4 = scmp.lt.s32.totalorder %s20_s13, %s20_s13 }
   0xc   :  { %p128_p3 = scmp.ne.s32.totalorder %s20_s13, %s127_s23  ;;  %p133_p5 = scmp.lt.s32.totalorder %s127_s23, %s127_s23 }
   0xe   :  { %p134_p6 = por %p133_p5, %p132_p4 }
  0x10   :  { %p135_p7 = pnand %p134_p6, %p128_p3 }
  0x12   :  { %138 = shalt.err (!%p135_p7)
}
  0x13   :  { %22 = dma.hbm_to_vmem [thread:$0]  %s302_s0, 128, %s20_s13, [#allocation5]  }
  0x14   :  { %s139_s28 = scalar_lea.hbm %s303_s1, 128 }
  0x15   :  { %p140_p8 = scmp.ne.s32.totalorder %s303_s1, %s139_s28  ;;  %p143_p9 = scmp.lt.u32.totalorder %s139_s28, %s303_s1 }
  0x17   :  { %p145_p10 = pnand %p143_p9, %p140_p8 }
  0x19   :  { %148 = shalt.err (!%p145_p10)
}
  0x1a   :  { %s149_s6 = scalar_lea.vmem %s30_s15, 128  ;;  %p154_p12 = scmp.lt.s32.totalorder %s30_s15, %s30_s15 }
  0x1b   :  { %p150_p11 = scmp.ne.s32.totalorder %s30_s15, %s149_s6  ;;  %p155_p13 = scmp.lt.s32.totalorder %s149_s6, %s149_s6 }
  0x1d   :  { %p156_p0 = por %p155_p13, %p154_p12 }
  0x1f   :  { %p157_p1 = pnand %p156_p0, %p150_p11 }
  0x21   :  { %160 = shalt.err (!%p157_p1)
}
  0x22   :  { %32 = dma.hbm_to_vmem [thread:$0]  %s303_s1, 128, %s30_s15, [#allocation8]  }
  0x23   :  { %205 = dma.done.wait [#allocation5], 128  }
  0x24   :  { %206 = vsyncadd [#allocation5], 4294967168 }
  0x25   :  { %207 = dma.done.wait [#allocation8], 128  }
  0x26   :  { %208 = vsyncadd [#allocation8], 4294967168  ;;  %vm43_vm0 = vcmask 261120   ;;  %v215_v0 = vmov 0.0   ;;  %v46_v1 = vld [vmem:[#allocation7] sm:$0xff]  ;;  %v47_v2 = vld [vmem:[#allocation4] sm:$0xff] }
  0x27   :  { %45 = vst.msk [vmem:[#allocation3] sm:$0xff] %vm43_vm0, %v215_v0  ;;  %44 = vst.msk [vmem:[#allocation2] sm:$0xff] %vm43_vm0, %v215_v0  ;;  %v50_v3 = vmul.f32 %v46_v1, %v46_v1  ;;  %v48_v5 = vsub.f32 %v46_v1, %v47_v2  ;;  %s216_s1 = smov [#allocation10]   ;;  %vm71_vm1 = vcmask 253952   ;;  %s217_s9 = smov [#allocation9]  }
  0x28   :  { %s98_s8 = sshll.u32 %s216_s1, 4  ;;  %s88_s10 = sshll.u32 %s217_s9, 4  ;;  %s99_s8 = int_to_ptr.vmem [resolvable:$true] %s98_s8  ;;  %s269_s10 = int_to_ptr.vmem [resolvable:$true] %s88_s10 }
  0x29   :  { %v49_v8 = vmul.f32 %v48_v5, %v48_v5  ;;  %s161_s11 = scalar_lea.vmem %s99_s8, 16  ;;  %s165_s12 = scalar_lea.vmem %s99_s8, 32 }
  0x2a   :  { %p162_p2 = scmp.ne.s32.totalorder %s99_s8, %s161_s11  ;;  %p166_p3 = scmp.lt.s32.totalorder %s99_s8, %s99_s8 }
  0x2b   :  { %p167_p4 = scmp.lt.s32.totalorder %s165_s12, %s161_s11 }
  0x2d   :  { %p168_p5 = por %p167_p4, %p166_p3 }
  0x2e   :  { %v56_v4 = vld [vmem:[#allocation3] sm:$0xff]  ;;  %v51_v6 = vld [vmem:[#allocation2] sm:$0xff] }
  0x2f   :  { %v58_v7 = vadd.f32 %v56_v4, %v50_v3  ;;  %v53_v9 = vadd.f32 %v51_v6, %v49_v8  ;;  %p169_p6 = pnand %p168_p5, %p162_p2 }
  0x31   :  { %59 = vst.msk [vmem:[#allocation3] sm:$0xff] %vm43_vm0, %v58_v7  ;;  %55 = vst.msk [vmem:[#allocation2] sm:$0xff] %vm43_vm0, %v53_v9 }
  0x38   :  { %v73_v10 = vld [vmem:[#allocation3] sm:$0xff]  ;;  %v63_v13 = vld [vmem:[#allocation2] sm:$0xff] }
  0x39   :  { %v74_v11 = vsel %vm43_vm0, %v73_v10, 0.0  ;;  %v64_v14 = vsel %vm43_vm0, %v63_v13, 0.0 }
  0x3a   :  { %v75_v12 = vrot.slane %v74_v11, 4  ;;  %v65_v16 = vrot.slane %v64_v14, 4 }
  0x3c   :  { %v76_v15 = vadd.f32 %v75_v12, %v74_v11  ;;  %v66_v18 = vadd.f32 %v65_v16, %v64_v14 }
  0x3e   :  { %v77_v17 = vrot.slane %v76_v15, 2  ;;  %v67_v20 = vrot.slane %v66_v18, 2 }
  0x40   :  { %v78_v19 = vadd.f32 %v77_v17, %v76_v15  ;;  %v68_v22 = vadd.f32 %v67_v20, %v66_v18 }
  0x42   :  { %v79_v21 = vrot.slane %v78_v19, 1  ;;  %v69_v24 = vrot.slane %v68_v22, 1 }
  0x44   :  { %v80_v23 = vadd.f32 %v79_v21, %v78_v19  ;;  %v70_v25 = vadd.f32 %v69_v24, %v68_v22 }
  0x46   :  { %81 = vst.msk [vmem:[#allocation10] sm:$0x1] %vm71_vm1, %v80_v23 }
  0x47   :  { %172 = shalt.err (!%p169_p6)
}
  0x48   :  { %s173_s15 = scalar_lea.hbm %s305_s3, 16 }
  0x49   :  { %p174_p7 = scmp.ne.s32.totalorder %s305_s3, %s173_s15  ;;  %p177_p8 = scmp.lt.u32.totalorder %s173_s15, %s305_s3 }
  0x4b   :  { %p179_p9 = pnand %p177_p8, %p174_p7 }
  0x4d   :  { %182 = shalt.err (!%p179_p9)
}
  0x4e   :  { %101 = dma.vmem_to_hbm [thread:$0]  %s99_s8, 16, %s305_s3, [#allocation11]   ;;  %72 = vst.msk [vmem:[#allocation9] sm:$0x1] %vm71_vm1, %v70_v25 }
  0x4f   :  { %s183_s22 = scalar_lea.vmem %s269_s10, 16  ;;  %s187_s23 = scalar_lea.vmem %s269_s10, 32 }
  0x50   :  { %p184_p10 = scmp.ne.s32.totalorder %s269_s10, %s183_s22  ;;  %p188_p11 = scmp.lt.s32.totalorder %s269_s10, %s269_s10 }
  0x51   :  { %p189_p12 = scmp.lt.s32.totalorder %s187_s23, %s183_s22 }
  0x53   :  { %p190_p13 = por %p189_p12, %p188_p11 }
  0x55   :  { %p191_p0 = pnand %p190_p13, %p184_p10 }
  0x57   :  { %194 = shalt.err (!%p191_p0)
}
  0x58   :  { %s195_s26 = scalar_lea.hbm %s304_s2, 16 }
  0x59   :  { %p196_p1 = scmp.ne.s32.totalorder %s304_s2, %s195_s26  ;;  %p199_p2 = scmp.lt.u32.totalorder %s195_s26, %s304_s2 }
  0x5b   :  { %p201_p3 = pnand %p199_p2, %p196_p1 }
  0x5d   :  { %204 = shalt.err (!%p201_p3)
}
  0x5e   :  { %91 = dma.vmem_to_hbm [thread:$0]  %s269_s10, 16, %s304_s2, [#allocation6]  }
  0x5f   :  { %209 = dma.done.wait [#allocation6], 16  }
  0x60   :  { %210 = vsyncadd [#allocation6], 4294967280 }
  0x61   :  { %211 = dma.done.wait [#allocation11], 16  }
  0x62   :  { %212 = vsyncadd [#allocation11], 4294967280 }
  0x63   :  { %108 = vsyncpa [#allocation5], 1 }
  0x64   :  { %109 = vsyncpa [#allocation8], 1 }
  0x65   :  { %110 = vsyncpa [#allocation6], 1 }
  0x66   :  { %111 = vsyncpa [#allocation11], 1 }

</bundles_post_ra>
